<compile_context>
chip_gen: v6e
topology: v6e:2x2x1
jax: 0.10.0
libtpu: 0.0.40
codegen_flags: <defaults>
</compile_context>

<pallas_src>
import jax
import jax.numpy as jnp
from jax.experimental import pallas as pl
from jax.experimental.pallas import tpu as pltpu


_MAX_INFLIGHT = 4          # DMA copies kept in flight (review: 2-4)
_MAX_CHUNKS = 256          # cap static unroll of the DMA issue loop


def identity_passthrough(x):
    """Truly free identity: returns x (no kernel, no launch, no traffic)."""
    return x


def _make_dma_identity_kernel(chunk_starts, chunk_sizes, n_slots):
    """Build an HBM->HBM chunked-DMA copy kernel.

    chunk_starts / chunk_sizes are static Python ints (leading-axis offsets /
    extents).  The kernel issues one async copy per chunk, keeping at most
    `n_slots` DMAs in flight, then drains.
    """
    n_chunks = len(chunk_starts)

    def kernel(x_hbm, o_hbm, sems):
        def chunk_copy(c):
            s, n = chunk_starts[c], chunk_sizes[c]
            return pltpu.make_async_copy(
                x_hbm.at[pl.ds(s, n)],
                o_hbm.at[pl.ds(s, n)],
                sems.at[c % n_slots],
            )

        # Issue all chunk DMAs, reusing semaphore slots round-robin; before
        # reusing a slot, wait for the copy that previously occupied it.
        for c in range(n_chunks):
            if c >= n_slots:
                chunk_copy(c - n_slots).wait()
            chunk_copy(c).start()

        # Drain the copies still in flight.
        for c in range(max(0, n_chunks - n_slots), n_chunks):
            chunk_copy(c).wait()

    return kernel


def identity(x, *, chunk_bytes=16 * 1024 * 1024):
    """Identity forward pass: returns a fresh array equal to x (shape, dtype,
    bits preserved), implemented as chunked HBM->HBM DMA in a Pallas kernel.

    `chunk_bytes` controls the per-DMA chunk size along the leading axis
    (default 16 MiB; only affects overlap granularity, not VMEM -- the kernel
    allocates no VMEM buffers at all).
    """
    x = jnp.asarray(x)
    if x.ndim == 0 or x.size == 0:
        # Nothing to tile / DMA; kernel launch overhead would dominate.
        return x

    rows = x.shape[0]
    itemsize = jnp.dtype(x.dtype).itemsize
    total_bytes = x.size * itemsize
    row_bytes = max(1, total_bytes // rows)

    # Chunk along the leading axis: each chunk is ~chunk_bytes (at least one
    # leading-index per chunk), capped so the static issue loop stays small.
    chunk_rows = max(1, chunk_bytes // row_bytes)
    chunk_rows = max(chunk_rows, -(-rows // _MAX_CHUNKS))
    n_chunks = -(-rows // chunk_rows)
    chunk_starts = tuple(c * chunk_rows for c in range(n_chunks))
    chunk_sizes = tuple(min(chunk_rows, rows - s) for s in chunk_starts)
    n_slots = min(_MAX_INFLIGHT, n_chunks)

    kernel = _make_dma_identity_kernel(chunk_starts, chunk_sizes, n_slots)

    return pl.pallas_call(
        kernel,
        out_shape=jax.ShapeDtypeStruct(x.shape, x.dtype),
        in_specs=[pl.BlockSpec(memory_space=pl.ANY)],    # raw HBM ref, no auto-DMA
        out_specs=pl.BlockSpec(memory_space=pl.ANY),     # written only via DMA
        scratch_shapes=[pltpu.SemaphoreType.DMA((n_slots,))],
        cost_estimate=pl.CostEstimate(
            flops=0, transcendentals=0, bytes_accessed=2 * total_bytes),
    )(x)


# Kept for API compatibility with the previous version: the materializing copy
# and the primary path are now the same (roofline HBM->HBM DMA) kernel.
identity_copy = identity


if __name__ == "__main__":
    key = jax.random.PRNGKey(0)
    k0, k1, k2 = jax.random.split(key, 3)

    # Small NCHW input consistent with typical conv-style usage.
    x = jax.random.normal(k0, (2, 4, 16, 16), dtype=jnp.float32)
    y = jax.block_until_ready(identity(x))
    assert y.shape == x.shape
    assert y.dtype == x.dtype
    assert jnp.array_equal(y, x)

    # Odd element count (not a multiple of 128): previously the OOM-prone
    # fallback; now just chunked DMA on the original shape.
    x_odd = jax.random.normal(k1, (3, 5, 7), dtype=jnp.float32)
    y_odd = jax.block_until_ready(identity(x_odd))
    assert y_odd.shape == x_odd.shape and y_odd.dtype == x_odd.dtype
    assert jnp.array_equal(y_odd, x_odd)

    # Sub-32-bit dtype + tiny chunk_bytes to exercise multi-chunk issue,
    # semaphore-slot reuse (4 in flight) and the drain loop.
    x_bf = jax.random.normal(k2, (32, 8, 128), dtype=jnp.bfloat16)
    y_bf = jax.block_until_ready(identity(x_bf, chunk_bytes=4096))
    assert y_bf.shape == x_bf.shape and y_bf.dtype == x_bf.dtype
    assert jnp.array_equal(y_bf, x_bf)

    print("KERNEL_OK")
</pallas_src>

<mosaic_0001>
module attributes {stable_mosaic.version = 11 : i64} {
  func.func @kernel(%arg0: memref<2x4x16x16xf32, #tpu.memory_space<any>>, %arg1: memref<2x4x16x16xf32, #tpu.memory_space<any>>, %arg2: memref<1x!tpu.dma_semaphore, #tpu.memory_space<semaphore_mem>>) attributes {dimension_semantics = [], scalar_prefetch = 0 : i64, scratch_operands = 1 : i64, tpu.core_type = #tpu.core_type<tc>} {
    %c0_i32 = arith.constant 0 : i32
    %c0_i32_0 = arith.constant 0 : i32
    %c0_i32_1 = arith.constant 0 : i32
    %c0_i32_2 = arith.constant 0 : i32
    %c0_i32_3 = arith.constant 0 : i32
    %0 = tpu.memref_slice %arg0[%c0_i32_0, %c0_i32_1, %c0_i32_2, %c0_i32_3] : memref<2x4x16x16xf32, #tpu.memory_space<any>> -> memref<2x4x16x16xf32, #tpu.memory_space<any>>
    %c0_i32_4 = arith.constant 0 : i32
    %c0_i32_5 = arith.constant 0 : i32
    %c0_i32_6 = arith.constant 0 : i32
    %c0_i32_7 = arith.constant 0 : i32
    %1 = tpu.memref_slice %arg1[%c0_i32_4, %c0_i32_5, %c0_i32_6, %c0_i32_7] : memref<2x4x16x16xf32, #tpu.memory_space<any>> -> memref<2x4x16x16xf32, #tpu.memory_space<any>>
    %2 = tpu.memref_slice %arg2[%c0_i32] : memref<1x!tpu.dma_semaphore, #tpu.memory_space<semaphore_mem>> -> memref<1x!tpu.dma_semaphore, #tpu.memory_space<semaphore_mem>>
    %3 = tpu.memref_squeeze %2 : memref<1x!tpu.dma_semaphore, #tpu.memory_space<semaphore_mem>> -> memref<!tpu.dma_semaphore, #tpu.memory_space<semaphore_mem>>
    tpu.enqueue_dma source(%0 : memref<2x4x16x16xf32, #tpu.memory_space<any>>) target(%1 : memref<2x4x16x16xf32, #tpu.memory_space<any>>) target_semaphore(%3 : memref<!tpu.dma_semaphore, #tpu.memory_space<semaphore_mem>>)
    %c0_i32_8 = arith.constant 0 : i32
    %c0_i32_9 = arith.constant 0 : i32
    %c0_i32_10 = arith.constant 0 : i32
    %c0_i32_11 = arith.constant 0 : i32
    %c0_i32_12 = arith.constant 0 : i32
    %4 = tpu.memref_slice %arg0[%c0_i32_9, %c0_i32_10, %c0_i32_11, %c0_i32_12] : memref<2x4x16x16xf32, #tpu.memory_space<any>> -> memref<2x4x16x16xf32, #tpu.memory_space<any>>
    %c0_i32_13 = arith.constant 0 : i32
    %c0_i32_14 = arith.constant 0 : i32
    %c0_i32_15 = arith.constant 0 : i32
    %c0_i32_16 = arith.constant 0 : i32
    %5 = tpu.memref_slice %arg1[%c0_i32_13, %c0_i32_14, %c0_i32_15, %c0_i32_16] : memref<2x4x16x16xf32, #tpu.memory_space<any>> -> memref<2x4x16x16xf32, #tpu.memory_space<any>>
    %6 = tpu.memref_slice %arg2[%c0_i32_8] : memref<1x!tpu.dma_semaphore, #tpu.memory_space<semaphore_mem>> -> memref<1x!tpu.dma_semaphore, #tpu.memory_space<semaphore_mem>>
    %7 = tpu.memref_squeeze %6 : memref<1x!tpu.dma_semaphore, #tpu.memory_space<semaphore_mem>> -> memref<!tpu.dma_semaphore, #tpu.memory_space<semaphore_mem>>
    tpu.wait_dma2 semaphore(%7 : memref<!tpu.dma_semaphore, #tpu.memory_space<semaphore_mem>>) src(%4 : memref<2x4x16x16xf32, #tpu.memory_space<any>>) dst(%5 : memref<2x4x16x16xf32, #tpu.memory_space<any>>)
    return
  }
}

</mosaic_0001>

<bundles_post_ra>
// kernel: tpu_custom_call.1
= control target key start
LH: loop header
LB: loop body
LE: loop exit
PB: predicated region body
PF: predicated region fallthrough
CT: control target
= control target key end

     0   :  { %s30_s6 = smov [#allocation2]   ;;  %s31_s7 = smov 131072   ;;  %s49_s0 = inlined_call_operand.hbm [shape: f32[2,4,16,16], index: 0, kind: input, shape index: {}]   ;;  %s50_s1 = inlined_call_operand.hbm [shape: f32[2,4,16,16], index: 1, kind: output, shape index: {}]  }
   0x1   :  { %s32_s8 = smov 0  }
   0x2   :  { %12 = dma.general %s49_s0, 2048, %s50_s1, %s30_s6, %s31_s7, [#allocation4], %s32_s8, 0  }
   0x3   :  { %28 = dma.done.wait [#allocation2], 2048 }
   0x4   :  { %29 = vsyncadd [#allocation2], 4294965248 }
   0x5   :  { %18 = vsyncmov [#allocation2] }
   0x8   :  { %s19_s13 = vpop.sfrf %18 }
   0x9   :  { %p24_p0 = scmp.ne.s32.totalorder %s19_s13, 0 }
   0xb   :  { %23 = shalt.err (%p24_p0)  }

</bundles_post_ra>
